<compile_context>
chip_gen: v7x
topology: tpu7x:2x2x1
jax: 0.10.0
libtpu: 0.0.40
codegen_flags: <defaults>
</compile_context>

<pallas_src>
import functools

import jax
import jax.numpy as jnp
from jax.experimental import pallas as pl
from jax.experimental.pallas import tpu as pltpu


def _round_up(x, m):
    return (x + m - 1) // m * m


_SINGLE_K_MAX = 4096           # if Kp <= this, use a single K step (tk = Kp)
_TN_MAX = 512                  # lane-dense output tiles; 4096-wide layers -> 8 parallel N tiles
_W_TILE_BYTES_MAX = 4 << 20    # max bf16 weight tile per grid step (8 MiB double-buffered)
_VMEM_LIMIT_BYTES = 32 << 20   # explicit scoped-VMEM budget (safe on v5e/v6e/v7x)


# ----------------------------------------------------------------------------
# Shared tiling plan (used by both pack_weight at init and fused_matmul at call).
# ----------------------------------------------------------------------------
def _tile_plan(K, N):
    Np = _round_up(N, 128)
    if Np > _TN_MAX:
        Np = _round_up(N, _TN_MAX)
    tn = min(Np, _TN_MAX)
    gn = Np // tn

    Kp = _round_up(K, 128)
    if Kp <= _SINGLE_K_MAX:
        tk = Kp
    else:
        # Largest multiple-of-128 divisor of Kp whose bf16 (tk, tn) tile fits the budget.
        tk = 128
        for d in range(128, Kp + 1, 128):
            if Kp % d == 0 and d * tn * 2 <= _W_TILE_BYTES_MAX:
                tk = d
    gk = Kp // tk
    return Kp, Np, tk, tn, gk, gn


def pack_weight(w):
    """(K, N) f32 -> tile-major (gk, gn, tk, tn) bf16, zero-padded.

    Tile-major layout means each per-step weight DMA is one contiguous slab.
    """
    K, N = w.shape
    Kp, Np, tk, tn, gk, gn = _tile_plan(K, N)
    wp = jnp.pad(w, ((0, Kp - K), (0, Np - N))).astype(jnp.bfloat16)
    return wp.reshape(gk, tk, gn, tn).transpose(0, 2, 1, 3)  # (gk, gn, tk, tn)


# ----------------------------------------------------------------------------
# Fused Pallas kernel:   out = maybe_relu(x @ w + b)
# Grid = (M tiles, N tiles, K tiles); K (last, "arbitrary") is the reduction axis.
# bf16 operands, f32 accumulation.  Single-K layers skip the accumulator scratch.
# ----------------------------------------------------------------------------
def _mm_kernel(x_ref, w_ref, b_ref, o_ref, *acc, relu, single_k, x_resident):
    if single_k:
        r = jnp.dot(x_ref[...], w_ref[...], preferred_element_type=jnp.float32)
        r = r + b_ref[...]
        if relu:
            r = jnp.maximum(r, 0.0)
        o_ref[...] = r.astype(o_ref.dtype)
        return

    (acc_ref,) = acc
    k = pl.program_id(2)

    @pl.when(k == 0)
    def _init():
        acc_ref[...] = jnp.zeros_like(acc_ref)

    # x either arrives as a (tm, tk) tile, or fully K-resident as (gk, tm, tk)
    # (DMA'd once, constant index_map) and sliced by the K grid step here.
    xs = x_ref[k] if x_resident else x_ref[...]
    acc_ref[...] += jnp.dot(xs, w_ref[...], preferred_element_type=jnp.float32)

    @pl.when(k == pl.num_programs(2) - 1)
    def _finalize():
        r = acc_ref[...] + b_ref[...]
        if relu:
            r = jnp.maximum(r, 0.0)
        o_ref[...] = r.astype(o_ref.dtype)


def fused_matmul(x, wp, b, *, relu=False):
    """y = maybe_relu(x @ W + b).

    x:  (M, K) f32 activations (padded/cast to bf16 here — cheap, M is tiny).
    wp: (gk, gn, tk, tn) bf16 pre-packed weight from pack_weight().
    b:  (N,) f32 bias.
    Returns (M, N) f32.
    """
    M, K = x.shape
    N = b.shape[0]
    Kp, Np, tk, tn, gk, gn = _tile_plan(K, N)
    assert wp.shape == (gk, gn, tk, tn), (wp.shape, (gk, gn, tk, tn))

    tm = min(128, _round_up(M, 16))          # 16 = bf16 sublane packing
    Mp = _round_up(M, tm)
    gm = Mp // tm

    xp = jnp.pad(x, ((0, Mp - M), (0, Kp - K))).astype(jnp.bfloat16)
    bp = jnp.pad(b.astype(jnp.float32).reshape(1, N), ((0, 0), (0, Np - N)))

    # LHS: keep fully K-resident (single DMA, constant block index) when it is a single
    # small M tile in a multi-step reduction; otherwise stream (tm, tk) tiles.
    x_resident = (gk > 1) and (Mp == tm) and (tm * Kp * 2 <= (4 << 20))
    if x_resident:
        x_in = xp.reshape(tm, gk, tk).transpose(1, 0, 2)          # (gk, tm, tk)
        x_spec = pl.BlockSpec((gk, tm, tk), lambda i, j, k: (0, 0, 0))
    else:
        x_in = xp
        x_spec = pl.BlockSpec((tm, tk), lambda i, j, k: (i, k))

    # Tile-major weight: one contiguous (tk, tn) slab per step.
    w_spec = pl.BlockSpec((None, None, tk, tn), lambda i, j, k: (k, j, 0, 0))
    b_spec = pl.BlockSpec((1, tn), lambda i, j, k: (0, j))
    out_spec = pl.BlockSpec((tm, tn), lambda i, j, k: (i, j))

    single_k = gk == 1
    scratch = [] if single_k else [pltpu.VMEM((tm, tn), jnp.float32)]

    out = pl.pallas_call(
        functools.partial(_mm_kernel, relu=relu, single_k=single_k,
                          x_resident=x_resident),
        out_shape=jax.ShapeDtypeStruct((Mp, Np), jnp.float32),
        grid_spec=pltpu.PrefetchScalarGridSpec(
            num_scalar_prefetch=0,
            grid=(gm, gn, gk),
            in_specs=[x_spec, w_spec, b_spec],
            out_specs=out_spec,
            scratch_shapes=scratch,
        ),
        compiler_params=pltpu.CompilerParams(
            dimension_semantics=("parallel", "parallel", "arbitrary"),
            vmem_limit_bytes=_VMEM_LIMIT_BYTES),
    )(x_in, wp, bp)
    return out[:M, :N]


# ----------------------------------------------------------------------------
# Glue (patch extraction / pooling) in plain JAX, under jit.
# ----------------------------------------------------------------------------
def extract_patches(x, k, s, p):
    """NHWC -> (N, OH, OW, C*k*k) patches, channel-major patch ordering (c, kh, kw)."""
    return jax.lax.conv_general_dilated_patches(
        x, (k, k), (s, s), [(p, p), (p, p)],
        dimension_numbers=('NHWC', 'HWIO', 'NHWC'))


def max_pool_3x3_s2(x):
    return jax.lax.reduce_window(x, -jnp.inf, jax.lax.max,
                                 (1, 3, 3, 1), (1, 2, 2, 1), 'VALID')


def adaptive_avg_pool(x, out_h, out_w):
    """PyTorch AdaptiveAvgPool2d semantics on NHWC input (fast paths + fallback)."""
    n, h, w, c = x.shape
    if h == out_h and w == out_w:
        return x
    if out_h % h == 0 and out_w % w == 0:
        x = jnp.repeat(x, out_h // h, axis=1)
        return jnp.repeat(x, out_w // w, axis=2)
    if h % out_h == 0 and w % out_w == 0:
        return x.reshape(n, out_h, h // out_h, out_w, w // out_w, c).mean(axis=(2, 4))
    rows = []
    for i in range(out_h):
        hs, he = (i * h) // out_h, -(-((i + 1) * h) // out_h)
        cols = []
        for j in range(out_w):
            ws, we = (j * w) // out_w, -(-((j + 1) * w) // out_w)
            cols.append(jnp.mean(x[:, hs:he, ws:we, :], axis=(1, 2)))
        rows.append(jnp.stack(cols, axis=1))
    return jnp.stack(rows, axis=1)


# ----------------------------------------------------------------------------
# Deterministic synthetic parameters (AlexNet features + truncated classifier
# + ProtoNetwork encoder).  No checkpoint loading.  Weights pre-packed (bf16,
# padded, tile-major) once here — the params pytree contains arrays only.
# ----------------------------------------------------------------------------
_CONV_CFG = [  # (in_ch, out_ch, kernel, stride, pad)
    (3, 64, 11, 4, 2),
    (64, 192, 5, 1, 2),
    (192, 384, 3, 1, 1),
    (384, 256, 3, 1, 1),
    (256, 256, 3, 1, 1),
]


def init_params(key):
    keys = jax.random.split(key, 18)
    convs = []
    ki = 0
    for ic, oc, k, s, p in _CONV_CFG:
        fan_in = ic * k * k
        # Weight laid out (ic, kh, kw, oc) to match the channel-major patch ordering
        # of conv_general_dilated_patches.
        w = jax.random.normal(keys[ki], (ic, k, k, oc), jnp.float32) * (2.0 / fan_in) ** 0.5
        b = jax.random.normal(keys[ki + 1], (oc,), jnp.float32) * 0.01
        convs.append((pack_weight(w.reshape(ic * k * k, oc)), b))
        ki += 2

    fc_w = jax.random.normal(keys[10], (9216, 4096), jnp.float32) * (2.0 / 9216) ** 0.5
    fc_b = jax.random.normal(keys[11], (4096,), jnp.float32) * 0.01
    # 1x1-feature-map fold: NCHW flatten index = c*36 + s; pre-sum the 36 spatial rows.
    fc_w_fold = fc_w.reshape(256, 36, 4096).sum(axis=1)

    enc_w = jax.random.normal(keys[12], (4096, 4096), jnp.float32) * (1.0 / 4096) ** 0.5
    enc_b = jax.random.normal(keys[13], (4096,), jnp.float32) * 0.01
    bn_gamma = 1.0 + 0.1 * jax.random.normal(keys[14], (4096,), jnp.float32)
    bn_beta = 0.1 * jax.random.normal(keys[15], (4096,), jnp.float32)
    bn_mean = 0.1 * jax.random.normal(keys[16], (4096,), jnp.float32)
    bn_var = jax.random.uniform(keys[17], (4096,), jnp.float32, 0.5, 1.5)

    # Fold eval-mode BatchNorm1d into the encoder Linear (no ReLU between them, so exact).
    scale = bn_gamma * jax.lax.rsqrt(bn_var + 1e-5)
    shift = bn_beta - bn_mean * scale
    enc_w_folded = enc_w * scale[None, :]
    enc_b_folded = enc_b * scale + shift

    return dict(convs=convs,
                fc_w=pack_weight(fc_w), fc_w_fold=pack_weight(fc_w_fold), fc_b=fc_b,
                enc_w=pack_weight(enc_w_folded), enc_b=enc_b_folded)


# ----------------------------------------------------------------------------
# Forward pass: ProtoNetwork.forward(x) = encoder(backbone(x))
# ----------------------------------------------------------------------------
@jax.jit
def proto_network_forward(params, x_nchw):
    x = jnp.transpose(x_nchw, (0, 2, 3, 1)).astype(jnp.float32)  # NCHW -> NHWC
    n = x.shape[0]

    # AlexNet features (Conv+ReLU [+MaxPool after layers 0, 1, 4])
    for idx, ((ic, oc, k, s, p), (wp, b)) in enumerate(zip(_CONV_CFG, params["convs"])):
        patches = extract_patches(x, k, s, p)
        _, oh, ow, ck2 = patches.shape
        x = fused_matmul(patches.reshape(n * oh * ow, ck2), wp, b, relu=True)
        x = x.reshape(n, oh, ow, oc)
        if idx in (0, 1, 4):
            x = max_pool_3x3_s2(x)

    fh, fw = x.shape[1], x.shape[2]
    if fh == 1 and fw == 1:
        # AdaptiveAvgPool2d((6,6)) on a 1x1 map is a pure upsample: the flattened
        # 9216-dim FC input is 36 identical copies of each channel, so run the FC
        # against the pre-summed 256x4096 weight (36x less HBM weight traffic).
        x = fused_matmul(x.reshape(n, -1), params["fc_w_fold"], params["fc_b"], relu=True)
    else:
        # General path: avgpool + NCHW flatten + full 9216x4096 FC.
        x = adaptive_avg_pool(x, 6, 6)
        x = jnp.transpose(x, (0, 3, 1, 2)).reshape(n, -1)  # (N, 256*6*6) = (N, 9216)
        x = fused_matmul(x, params["fc_w"], params["fc_b"], relu=True)

    # Encoder: Linear(4096, 4096) -> BatchNorm1d (eval mode) — BN affine folded into
    # the packed weight/bias at init, so this is a single plain matmul.
    # TODO(synk): training-mode BatchNorm1d (batch statistics + running-stat update) not implemented.
    return fused_matmul(x, params["enc_w"], params["enc_b"], relu=False)


if __name__ == "__main__":
    key = jax.random.PRNGKey(0)
    pkey, xkey = jax.random.split(key)

    # Sanity check 1: single-K path (no accumulator) against plain jnp.
    a = jax.random.normal(jax.random.PRNGKey(1), (5, 300), jnp.float32)
    wchk = jax.random.normal(jax.random.PRNGKey(2), (300, 200), jnp.float32)
    bchk = jax.random.normal(jax.random.PRNGKey(3), (200,), jnp.float32)
    got = fused_matmul(a, pack_weight(wchk), bchk, relu=True)
    ref = jnp.maximum(
        a.astype(jnp.bfloat16).astype(jnp.float32)
        @ wchk.astype(jnp.bfloat16).astype(jnp.float32) + bchk, 0.0)
    assert got.shape == (5, 200)
    assert bool(jnp.allclose(got, ref, rtol=2e-2, atol=2e-2))

    # Sanity check 2: multi-K path (K-resident LHS, tile-major weights, f32 accumulator).
    a2 = jax.random.normal(jax.random.PRNGKey(4), (2, 9216), jnp.float32)
    w2 = jax.random.normal(jax.random.PRNGKey(5), (9216, 1024), jnp.float32) * 0.01
    b2 = jax.random.normal(jax.random.PRNGKey(6), (1024,), jnp.float32) * 0.01
    got2 = fused_matmul(a2, pack_weight(w2), b2, relu=False)
    ref2 = (a2.astype(jnp.bfloat16).astype(jnp.float32)
            @ w2.astype(jnp.bfloat16).astype(jnp.float32) + b2)
    assert got2.shape == (2, 1024)
    assert bool(jnp.allclose(got2, ref2, rtol=3e-2, atol=3e-2))

    params = init_params(pkey)
    # Small NCHW input (PyTorch convention). 64x64 flows through all AlexNet stages;
    # the final feature map is 1x1, so the FC-fold fast path is exercised.
    x = jax.random.normal(xkey, (2, 3, 64, 64), jnp.float32)

    out = jax.block_until_ready(proto_network_forward(params, x))
    assert out.shape == (2, 4096), out.shape
    assert bool(jnp.all(jnp.isfinite(out)))
    print("KERNEL_OK")
</pallas_src>

<mosaic_0001>
module attributes {stable_mosaic.version = 11 : i64} {
  func.func @_mm_kernel(%arg0: i32, %arg1: i32, %arg2: i32, %arg3: memref<16x384xbf16, #tpu.memory_space<vmem>>, %arg4: memref<1x1x384x256xbf16, #tpu.memory_space<vmem>>, %arg5: memref<1x256xf32, #tpu.memory_space<vmem>>, %arg6: memref<16x256xf32, #tpu.memory_space<vmem>>) attributes {dimension_semantics = [#tpu.dimension_semantics<parallel>, #tpu.dimension_semantics<parallel>, #tpu.dimension_semantics<arbitrary>], iteration_bounds = array<i64: 1, 1, 1>, scalar_prefetch = 0 : i64, scratch_operands = 0 : i64, tpu.core_type = #tpu.core_type<tc>, window_params = [{transform_indices = @transform_0, window_bounds = array<i64: 16, 384>}, {transform_indices = @transform_1, window_bounds = array<i64: 1, 1, 384, 256>}, {transform_indices = @transform_2, window_bounds = array<i64: 1, 256>}, {transform_indices = @transform_3, window_bounds = array<i64: 16, 256>}]} {
    %c0 = arith.constant 0 : index
    %c0_0 = arith.constant 0 : index
    %0 = vector.load %arg3[%c0, %c0_0] : memref<16x384xbf16, #tpu.memory_space<vmem>>, vector<16x384xbf16>
    %c0_1 = arith.constant 0 : index
    %c0_2 = arith.constant 0 : index
    %c0_3 = arith.constant 0 : index
    %c0_4 = arith.constant 0 : index
    %1 = vector.load %arg4[%c0_1, %c0_2, %c0_3, %c0_4] : memref<1x1x384x256xbf16, #tpu.memory_space<vmem>>, vector<1x1x384x256xbf16>
    %2 = vector.shape_cast %1 : vector<1x1x384x256xbf16> to vector<384x256xbf16>
    %cst = arith.constant dense<0.000000e+00> : vector<16x256xf32>
    %3 = tpu.matmul %0, %2, %cst {dimension_numbers = #tpu.dot_dimension_numbers<[1], [0], [0], [1], [0, 0, 1, 1], [], []>} : vector<16x384xbf16>, vector<384x256xbf16>, vector<16x256xf32> -> vector<16x256xf32>
    %c0_5 = arith.constant 0 : index
    %c0_6 = arith.constant 0 : index
    %4 = vector.load %arg5[%c0_5, %c0_6] : memref<1x256xf32, #tpu.memory_space<vmem>>, vector<1x256xf32>
    %5 = vector.broadcast %4 : vector<1x256xf32> to vector<16x256xf32>
    %6 = arith.addf %3, %5 : vector<16x256xf32>
    %cst_7 = arith.constant 0.000000e+00 : f32
    %7 = vector.broadcast %cst_7 : f32 to vector<16x256xf32>
    %8 = arith.maximumf %6, %7 : vector<16x256xf32>
    %c0_8 = arith.constant 0 : index
    %c0_9 = arith.constant 0 : index
    %9 = vector.load %arg6[%c0_8, %c0_9] : memref<16x256xf32, #tpu.memory_space<vmem>>, vector<16x256xf32>
    tpu.vector_store %arg6[%c0_8, %c0_9], %8 {strides = array<i32>} : memref<16x256xf32, #tpu.memory_space<vmem>>, vector<16x256xf32>,
    return
  }
  func.func @transform_0(%arg0: i32, %arg1: i32, %arg2: i32) -> (i32, i32) {
    %c0_i32 = arith.constant 0 : i32
    return %arg0, %arg2 : i32, i32
  }
  func.func @transform_1(%arg0: i32, %arg1: i32, %arg2: i32) -> (i32, i32, i32, i32) {
    %c0_i32 = arith.constant 0 : i32
    %c0_i32_0 = arith.constant 0 : i32
    %c0_i32_1 = arith.constant 0 : i32
    return %arg2, %arg1, %c0_i32, %c0_i32_0 : i32, i32, i32, i32
  }
  func.func @transform_2(%arg0: i32, %arg1: i32, %arg2: i32) -> (i32, i32) {
    %c0_i32 = arith.constant 0 : i32
    %c0_i32_0 = arith.constant 0 : i32
    return %c0_i32, %arg1 : i32, i32
  }
  func.func @transform_3(%arg0: i32, %arg1: i32, %arg2: i32) -> (i32, i32) {
    %c0_i32 = arith.constant 0 : i32
    return %arg0, %arg1 : i32, i32
  }
}

</mosaic_0001>

<bundles_post_ra>
// kernel: tpu_custom_call.1
= control target key start
LH: loop header
LB: loop body
LE: loop exit
PB: predicated region body
PF: predicated region fallthrough
CT: control target
= control target key end

     0   :  { %8 = vsyncpa [#allocation3], 0  ;;  %s762_s0 = inlined_call_operand.hbm [shape: bf16[16,384], index: 0, kind: input, shape index: {}]   ;;  %s763_s1 = inlined_call_operand.hbm [shape: bf16[1,1,384,256], index: 1, kind: input, shape index: {}]   ;;  %s764_s2 = inlined_call_operand.vmem [shape: f32[1,256], index: 2, kind: input, shape index: {}]   ;;  %s765_s3 = inlined_call_operand.hbm [shape: f32[16,256], index: 3, kind: output, shape index: {}]  }
   0x1   :  { %9 = vsyncpa [#allocation6], 0 }
   0x2   :  { %10 = vsyncpa [#allocation4], 0  ;;  %s693_s12 = smov [#allocation2]   ;;  %s621_s16 = scalar_lea.hbm %s762_s0, 384 }
   0x3   :  { %s16_s13 = sshll.u32 %s693_s12, 4  ;;  %p622_p0 = scmp.ne.s32.totalorder %s762_s0, %s621_s16  ;;  %s17_s13 = int_to_ptr.vmem [resolvable:$true] %s16_s13 }
   0x4   :  { %p625_p1 = scmp.lt.u32.totalorder %s621_s16, %s762_s0 }
   0x6   :  { %p627_p2 = pnand %p625_p1, %p622_p0 }
   0x8   :  { %630 = shalt.err (!%p627_p2)
}
   0x9   :  { %s631_s21 = scalar_lea.vmem %s17_s13, 384  ;;  %p636_p4 = scmp.lt.s32.totalorder %s17_s13, %s17_s13 }
   0xa   :  { %p632_p3 = scmp.ne.s32.totalorder %s17_s13, %s631_s21  ;;  %p637_p5 = scmp.lt.s32.totalorder %s631_s21, %s631_s21 }
   0xc   :  { %p638_p6 = por %p637_p5, %p636_p4 }
   0xe   :  { %p639_p7 = pnand %p638_p6, %p632_p3 }
  0x10   :  { %642 = shalt.err (!%p639_p7)
}
  0x11   :  { %s694_s22 = smov 192   ;;  %s695_s23 = smov 12  }
  0x12   :  { %22 = dma.hbm_to_vmem [thread:$0]  %s762_s0, 384, %s17_s13, [#allocation3], %s694_s22, %s694_s22, %s695_s23  }
  0x13   :  { %s696_s26 = smov [#allocation5]   ;;  %s643_s30 = scalar_lea.hbm %s763_s1, 6144 }
  0x14   :  { %s28_s27 = sshll.u32 %s696_s26, 4  ;;  %p644_p8 = scmp.ne.s32.totalorder %s763_s1, %s643_s30  ;;  %s29_s27 = int_to_ptr.vmem [resolvable:$true] %s28_s27 }
  0x15   :  { %p647_p9 = scmp.lt.u32.totalorder %s643_s30, %s763_s1 }
  0x17   :  { %p649_p10 = pnand %p647_p9, %p644_p8 }
  0x19   :  { %652 = shalt.err (!%p649_p10)
}
  0x1a   :  { %s653_s8 = scalar_lea.vmem %s29_s27, 6144  ;;  %p658_p12 = scmp.lt.s32.totalorder %s29_s27, %s29_s27 }
  0x1b   :  { %p654_p11 = scmp.ne.s32.totalorder %s29_s27, %s653_s8  ;;  %p659_p13 = scmp.lt.s32.totalorder %s653_s8, %s653_s8 }
  0x1d   :  { %p660_p0 = por %p659_p13, %p658_p12 }
  0x1f   :  { %p661_p1 = pnand %p660_p0, %p654_p11 }
  0x21   :  { %664 = shalt.err (!%p661_p1)
}
  0x22   :  { %s697_s0 = smov 128   ;;  %s698_s9 = smov 8  }
  0x23   :  { %34 = dma.hbm_to_vmem [thread:$0]  %s763_s1, 6144, %s29_s27, [#allocation6], %s697_s0, %s697_s0, %s698_s9  }
  0x24   :  { %687 = dma.done.wait [#allocation3], 384  }
  0x25   :  { %688 = vsyncadd [#allocation3], 4294966912 }
  0x26   :  { %689 = dma.done.wait [#allocation6], 6144  }
  0x27   :  { %690 = vsyncadd [#allocation6], 4294961152  ;;  %v699_v0 = vmov 0   ;;  %v545_v1 = vld [vmem:[#allocation5 + $0x4] ss:$8 sps:$4 sm:$0xff]   ;;  %v98_v56 = vlaneseq  ;;  %s700_s13 = smov [#allocation7]  }
  0x28   :  { %439 = vmatprep.mubr.bf16.mxu0 %v699_v0  ;;  %v547_v2 = vld [vmem:[#allocation5] ss:$8 sps:$4 sm:$0xff]   ;;  %364 = vmatprep.subr.bf16.mxu1 %v545_v1  ;;  %v548_v3 = vld [vmem:[#allocation5 + $0x14] ss:$8 sps:$4 sm:$0xff]   ;;  %v550_v4 = vld [vmem:[#allocation5 + $0x10] ss:$8 sps:$4 sm:$0xff]  }
  0x29   :  { %365 = vmatpush1.bf16.msra.mxu1 %v547_v2  ;;  %v551_v5 = vld [vmem:[#allocation5 + $0x24] ss:$8 sps:$4 sm:$0xff]   ;;  %v553_v6 = vld [vmem:[#allocation5 + $0x20] ss:$8 sps:$4 sm:$0xff]   ;;  %v554_v7 = vld [vmem:[#allocation5 + $0x34] ss:$8 sps:$4 sm:$0xff]  }
  0x2a   :  { %366 = vmatprep.subr.bf16.mxu1 %v548_v3  ;;  %v556_v8 = vld [vmem:[#allocation5 + $0x30] ss:$8 sps:$4 sm:$0xff]   ;;  %v569_v9 = vld [vmem:[#allocation5 + $0x104] ss:$8 sps:$4 sm:$0xff]   ;;  %v573_v11 = vld [vmem:[#allocation5 + $0x100] ss:$8 sps:$4 sm:$0xff]  }
  0x2b   :  { %v557_v10 = vld [vmem:[#allocation5 + $0x44] ss:$8 sps:$4 sm:$0xff]   ;;  %407 = vmatprep.subr.bf16.mxu0 %v569_v9  ;;  %v575_v12 = vld [vmem:[#allocation5 + $0x114] ss:$8 sps:$4 sm:$0xff]   ;;  %v559_v13 = vld [vmem:[#allocation5 + $0x40] ss:$8 sps:$4 sm:$0xff]  }
  0x2c   :  { %408 = vmatpush1.bf16.msra.mxu0 %v573_v11  ;;  %v560_v14 = vld [vmem:[#allocation5 + $0x54] ss:$8 sps:$4 sm:$0xff]   ;;  %v579_v15 = vld [vmem:[#allocation5 + $0x110] ss:$8 sps:$4 sm:$0xff]   ;;  %v581_v16 = vld [vmem:[#allocation5 + $0x124] ss:$8 sps:$4 sm:$0xff]  }
  0x2d   :  { %367 = vmatpush1.bf16.msra.mxu1 %v550_v4  ;;  %409 = vmatprep.subr.bf16.mxu0 %v575_v12  ;;  %v562_v17 = vld [vmem:[#allocation5 + $0x50] ss:$8 sps:$4 sm:$0xff]   ;;  %v585_v18 = vld [vmem:[#allocation5 + $0x120] ss:$8 sps:$4 sm:$0xff]   ;;  %v587_v19 = vld [vmem:[#allocation5 + $0x134] ss:$8 sps:$4 sm:$0xff]  }
  0x2e   :  { %368 = vmatprep.subr.bf16.mxu1 %v551_v5  ;;  %v563_v20 = vld [vmem:[#allocation5 + $0x64] ss:$8 sps:$4 sm:$0xff]   ;;  %v591_v21 = vld [vmem:[#allocation5 + $0x130] ss:$8 sps:$4 sm:$0xff]   ;;  %v565_v22 = vld [vmem:[#allocation5 + $0x60] ss:$8 sps:$4 sm:$0xff]  }
  0x2f   :  { %v593_v23 = vld [vmem:[#allocation5 + $0x144] ss:$8 sps:$4 sm:$0xff]   ;;  %v566_v24 = vld [vmem:[#allocation5 + $0x74] ss:$8 sps:$4 sm:$0xff]   ;;  %v568_v25 = vld [vmem:[#allocation5 + $0x70] ss:$8 sps:$4 sm:$0xff]  }
  0x30   :  { %410 = vmatpush1.bf16.msra.mxu0 %v579_v15  ;;  %v597_v26 = vld [vmem:[#allocation5 + $0x140] ss:$8 sps:$4 sm:$0xff]   ;;  %v599_v27 = vld [vmem:[#allocation5 + $0x154] ss:$8 sps:$4 sm:$0xff]   ;;  %v571_v28 = vld [vmem:[#allocation5 + $0x84] ss:$8 sps:$4 sm:$0xff]  }
  0x31   :  { %369 = vmatpush1.bf16.msra.mxu1 %v553_v6  ;;  %411 = vmatprep.subr.bf16.mxu0 %v581_v16  ;;  %v603_v29 = vld [vmem:[#allocation5 + $0x150] ss:$8 sps:$4 sm:$0xff]   ;;  %v574_v30 = vld [vmem:[#allocation5 + $0x80] ss:$8 sps:$4 sm:$0xff]   ;;  %v605_v31 = vld [vmem:[#allocation5 + $0x164] ss:$8 sps:$4 sm:$0xff]  }
  0x32   :  { %370 = vmatprep.subr.bf16.mxu1 %v554_v7  ;;  %v577_v32 = vld [vmem:[#allocation5 + $0x94] ss:$8 sps:$4 sm:$0xff]   ;;  %v619_v33 = vld [vmem:[#allocation2 + $0x4] ss:$12 sps:$4 sm:$0xff]   ;;  %v609_v34 = vld [vmem:[#allocation5 + $0x160] ss:$8 sps:$4 sm:$0xff]  }
  0x33   :  { %v580_v35 = vld [vmem:[#allocation5 + $0x90] ss:$8 sps:$4 sm:$0xff]   ;;  %v611_v36 = vld [vmem:[#allocation5 + $0x174] ss:$8 sps:$4 sm:$0xff]   ;;  %v583_v37 = vld [vmem:[#allocation5 + $0xa4] ss:$8 sps:$4 sm:$0xff]   ;;  %396 = vmatprep.mubr.bf16.mxu1 %v619_v33 }
  0x34   :  { %412 = vmatpush1.bf16.msra.mxu0 %v585_v18  ;;  %v615_v38 = vld [vmem:[#allocation5 + $0x170] ss:$8 sps:$4 sm:$0xff]   ;;  %v586_v39 = vld [vmem:[#allocation5 + $0xa0] ss:$8 sps:$4 sm:$0xff]   ;;  %v589_v40 = vld [vmem:[#allocation5 + $0xb4] ss:$8 sps:$4 sm:$0xff]  }
  0x35   :  { %371 = vmatpush1.bf16.msra.mxu1 %v556_v8  ;;  %413 = vmatprep.subr.bf16.mxu0 %v587_v19  ;;  %v620_v41 = vld [vmem:[#allocation2 + $0x8] ss:$12 sps:$4 sm:$0xff]   ;;  %v595_v43 = vld [vmem:[#allocation5 + $0xc4] ss:$8 sps:$4 sm:$0xff]   ;;  %v598_v44 = vld [vmem:[#allocation5 + $0xc0] ss:$8 sps:$4 sm:$0xff]  }
  0x36   :  { %372 = vmatprep.subr.bf16.mxu1 %v557_v10  ;;  %v592_v42 = vld [vmem:[#allocation5 + $0xb0] ss:$8 sps:$4 sm:$0xff]   ;;  %v601_v45 = vld [vmem:[#allocation5 + $0xd4] ss:$8 sps:$4 sm:$0xff]   ;;  %v607_v47 = vld [vmem:[#allocation5 + $0xe4] ss:$8 sps:$4 sm:$0xff]  }
  0x37   :  { %v604_v46 = vld [vmem:[#allocation5 + $0xd0] ss:$8 sps:$4 sm:$0xff]   ;;  %v610_v48 = vld [vmem:[#allocation5 + $0xe0] ss:$8 sps:$4 sm:$0xff]   ;;  %v613_v49 = vld [vmem:[#allocation5 + $0xf4] ss:$8 sps:$4 sm:$0xff]  }
  0x38   :  { %414 = vmatpush1.bf16.msra.mxu0 %v591_v21  ;;  %v616_v50 = vld [vmem:[#allocation5 + $0xf0] ss:$8 sps:$4 sm:$0xff]   ;;  %v617_v51 = vld [vmem:[#allocation2] ss:$12 sps:$4 sm:$0xff]   ;;  %v99_v57 = vshrl.u32 %v98_v56, 7  ;;  %s463_s14 = sshll.u32 %s700_s13, 4  ;;  %s464_s14 = int_to_ptr.vmem [resolvable:$true] %s463_s14 }
  0x39   :  { %373 = vmatpush1.bf16.msra.mxu1 %v559_v13  ;;  %415 = vmatprep.subr.bf16.mxu0 %v593_v23  ;;  %v96_v59 = vld [vmem:[%s764_s2] sm:$0x3]  ;;  %s665_s2 = scalar_lea.vmem %s464_s14, 512  ;;  %p670_p3 = scmp.lt.s32.totalorder %s464_s14, %s464_s14 }
  0x3a   :  { %374 = vmatprep.subr.bf16.mxu1 %v560_v14  ;;  %v100_v58 = vsub.s32 0, %v99_v57  ;;  %v104_v60 = vsub.s32 1, %v99_v57  ;;  %p666_p2 = scmp.ne.s32.totalorder %s464_s14, %s665_s2  ;;  %p671_p4 = scmp.lt.s32.totalorder %s665_s2, %s665_s2 }
  0x3c   :  { %416 = vmatpush1.bf16.msra.mxu0 %v597_v26  ;;  %v101_v61 = vrot.slane %v96_v59, %v100_v58  ;;  %v105_v62 = vrot.slane %v96_v59, %v104_v60  ;;  %p672_p5 = por %p671_p4, %p670_p3 }
  0x3d   :  { %375 = vmatpush1.bf16.msra.mxu1 %v562_v17  ;;  %417 = vmatprep.subr.bf16.mxu0 %v599_v27 }
  0x3e   :  { %376 = vmatprep.subr.bf16.mxu1 %v563_v20  ;;  %p673_p6 = pnand %p672_p5, %p666_p2 }
  0x40   :  { %418 = vmatpush1.bf16.msra.mxu0 %v603_v29 }
  0x41   :  { %377 = vmatpush1.bf16.msra.mxu1 %v565_v22  ;;  %419 = vmatprep.subr.bf16.mxu0 %v605_v31 }
  0x42   :  { %378 = vmatprep.subr.bf16.mxu1 %v566_v24 }
  0x44   :  { %420 = vmatpush1.bf16.msra.mxu0 %v609_v34 }
  0x45   :  { %379 = vmatpush1.bf16.msra.mxu1 %v568_v25  ;;  %421 = vmatprep.subr.bf16.mxu0 %v611_v36 }
  0x46   :  { %380 = vmatprep.subr.bf16.mxu1 %v571_v28 }
  0x48   :  { %422 = vmatpush1.bf16.msra.mxu0 %v615_v38 }
  0x49   :  { %381 = vmatpush1.bf16.msra.mxu1 %v574_v30 }
  0x4a   :  { %382 = vmatprep.subr.bf16.mxu1 %v577_v32 }
  0x4b   :  { %440 = vmatmul.mubr.bf16.vlgmr.msra.gmra.mrb[0].mxu0 %v620_v41 }
  0x4d   :  { %383 = vmatpush1.bf16.msra.mxu1 %v580_v35 }
  0x4e   :  { %384 = vmatprep.subr.bf16.mxu1 %v583_v37 }
  0x51   :  { %385 = vmatpush1.bf16.msra.mxu1 %v586_v39 }
  0x52   :  { %386 = vmatprep.subr.bf16.mxu1 %v589_v40 }
  0x55   :  { %387 = vmatpush1.bf16.msra.mxu1 %v592_v42 }
  0x56   :  { %388 = vmatprep.subr.bf16.mxu1 %v595_v43 }
  0x59   :  { %389 = vmatpush1.bf16.msra.mxu1 %v598_v44 }
  0x5a   :  { %390 = vmatprep.subr.bf16.mxu1 %v601_v45 }
  0x5d   :  { %391 = vmatpush1.bf16.msra.mxu1 %v604_v46 }
  0x5e   :  { %392 = vmatprep.subr.bf16.mxu1 %v607_v47 }
  0x61   :  { %393 = vmatpush1.bf16.msra.mxu1 %v610_v48 }
  0x62   :  { %394 = vmatprep.subr.bf16.mxu1 %v613_v49 }
  0x65   :  { %395 = vmatpush1.bf16.msra.mxu1 %v616_v50 }
  0x68   :  { %397 = vmatmul.mubr.bf16.vlgmr.msra.gmra.mrb[0].mxu1 %v617_v51 }
 0x11e   :  { %v441_v52 = vpop.f32.mrb[0].mxu0 }
 0x11f   :  { %v443_v53 = vpop.f32.mrb[1].mxu0 }
 0x120   :  { %v445_v54 = vpop.f32.mrb[2].mxu0 }
 0x121   :  { %v447_v55 = vpop.f32.mrb[3].mxu0 }
 0x13b   :  { %v398_v63 = vpop.f32.mrb[0].mxu1 }
 0x13c   :  { %v399_v0 = vadd.f32 %v398_v63, %v101_v61  ;;  %v400_v1 = vpop.f32.mrb[1].mxu1 }
 0x13d   :  { %v401_v2 = vadd.f32 %v400_v1, %v105_v62  ;;  %v402_v3 = vpop.f32.mrb[2].mxu1 }
 0x13e   :  { %v442_v4 = vadd.f32 %v441_v52, %v399_v0  ;;  %v403_v5 = vadd.f32 %v402_v3, %v101_v61  ;;  %v404_v6 = vpop.f32.mrb[3].mxu1 }
 0x13f   :  { %v444_v7 = vadd.f32 %v443_v53, %v401_v2  ;;  %v405_v8 = vadd.f32 %v404_v6, %v105_v62 }
 0x140   :  { %v450_v9 = vmax.f32 %v442_v4, 0.0  ;;  %v446_v10 = vadd.f32 %v445_v54, %v403_v5 }
 0x141   :  { %v451_v11 = vmax.f32 %v444_v7, 0.0  ;;  %v448_v12 = vadd.f32 %v447_v55, %v405_v8 }
 0x142   :  { %454 = vst [vmem:[#allocation7] sm:$0xff] %v450_v9  ;;  %v452_v13 = vmax.f32 %v446_v10, 0.0 }
 0x143   :  { %455 = vst [vmem:[#allocation7 + $0x8] sm:$0xff] %v451_v11  ;;  %v453_v14 = vmax.f32 %v448_v12, 0.0 }
 0x144   :  { %456 = vst [vmem:[#allocation7 + $0x10] sm:$0xff] %v452_v13 }
 0x145   :  { %457 = vst [vmem:[#allocation7 + $0x18] sm:$0xff] %v453_v14 }
 0x146   :  { %676 = shalt.err (!%p673_p6)
}
 0x147   :  { %s677_s17 = scalar_lea.hbm %s765_s3, 512 }
 0x148   :  { %p678_p7 = scmp.ne.s32.totalorder %s765_s3, %s677_s17  ;;  %p681_p8 = scmp.lt.u32.totalorder %s677_s17, %s765_s3 }
 0x14a   :  { %p683_p9 = pnand %p681_p8, %p678_p7 }
 0x14c   :  { %686 = shalt.err (!%p683_p9)
}
 0x14d   :  { %s701_s22 = smov 256   ;;  %s702_s23 = smov 16  }
 0x14e   :  { %469 = dma.vmem_to_hbm [thread:$0]  %s464_s14, 512, %s765_s3, [#allocation4], %s701_s22, %s701_s22, %s702_s23  }
 0x14f   :  { %691 = dma.done.wait [#allocation4], 512  }
 0x150   :  { %692 = vsyncadd [#allocation4], 4294966784 }
 0x151   :  { %473 = vsyncpa [#allocation3], 1 }
 0x152   :  { %474 = vsyncpa [#allocation6], 1 }
 0x153   :  { %475 = vsyncpa [#allocation4], 1 }

</bundles_post_ra>
